<compile_context>
chip_gen: v7x
topology: tpu7x:2x2x1
jax: 0.10.0
libtpu: 0.0.40
codegen_flags: <defaults>
</compile_context>

<pallas_src>
import functools

import jax
import jax.numpy as jnp
from jax.experimental import pallas as pl
from jax.experimental.pallas import tpu as pltpu

EXPANSION = 4


def _pick_row_tile(H, cap=128):
    """Largest multiple-of-8 divisor of H that is <= cap (else H itself)."""
    if H <= cap:
        return H
    best = H
    for t in range(8, cap + 1, 8):
        if H % t == 0:
            best = t
    return best


def _pack_weights(w1, w2, w3, ws, W, dtype):
    """Lane-packed (banded / block-diagonal) weight matrices, built once."""
    Cin, P = w1.shape
    Cout = w3.shape[1]
    Wp = W + 2
    f32 = jnp.float32

    # Fused [shortcut | conv1] weight, shape ((W+2)*Cin, W*Cout + (W+2)*P):
    #   lanes [0, W*Cout)        -> shortcut (reads interior padded columns)
    #   lanes [W*Cout, +(W+2)*P) -> conv1 (all padded columns; zero pad
    #                               commutes with the bias-free 1x1 conv)
    a_sc = jnp.kron(jnp.eye(Wp, W, k=-1, dtype=f32), ws)      # (Wp*Cin, W*Cout)
    a_c1 = jnp.kron(jnp.eye(Wp, dtype=f32), w1)               # (Wp*Cin, Wp*P)
    w1s = jnp.concatenate([a_sc, a_c1], axis=1)

    # conv2: fold the 3 dx taps into a band per dy tap (non-overlapping
    # supports, so this is placement, not summation of weights), then stack the
    # 3 dy taps along K -> ONE (3*Wp*P, W*P) matmul weight.
    w2c = jnp.concatenate([
        sum(jnp.kron(jnp.eye(Wp, W, k=-dx, dtype=f32), w2[dy, dx])
            for dx in range(3))
        for dy in range(3)], axis=0)                           # (3*Wp*P, W*P)

    # conv3: block-diagonal.
    w3b = jnp.kron(jnp.eye(W, dtype=f32), w3)                  # (W*P, W*Cout)

    return w1s.astype(dtype), w2c.astype(dtype), w3b.astype(dtype)


def _bottleneck_kernel(x_ref, w1s_ref, w2_ref, w3_ref, o_ref, *, TH, W, P, Cout):
    # x_ref:   (H+2, (W+2)*Cin)  zero-padded, lane-packed input (one image)
    # w1s_ref: ((W+2)*Cin, W*Cout + (W+2)*P)  fused [shortcut | conv1] weight
    # w2_ref:  (3*(W+2)*P, W*P)  conv2 weight, dy taps stacked along K
    # w3_ref:  (W*P, W*Cout)     conv3 block-diagonal weight
    # o_ref:   (TH, W*Cout)      lane-dense output rows for this tile
    r = pl.program_id(1)
    row0 = pl.multiple_of(r * TH, TH)
    SC = W * Cout

    # TH output rows + one halo row above/below (for the 3x3 conv).
    xrow = x_ref[pl.ds(row0, TH + 2), :]                       # (TH+2, (W+2)*Cin)

    # Fused conv1 + shortcut: single MXU pass over the shared operand.
    m1 = jnp.dot(xrow, w1s_ref[...], preferred_element_type=jnp.float32)
    h1p = jnp.maximum(m1[:, SC:], 0.0).astype(w2_ref.dtype)    # (TH+2, (W+2)*P)

    # conv2 (3x3, stride=1, pad=1): dy taps lane-concatenated -> one matmul
    # with K = 3*(W+2)*P instead of three small dots.
    h1cat = jnp.concatenate(
        [h1p[0:TH, :], h1p[1:TH + 1, :], h1p[2:TH + 2, :]], axis=1)
    h2 = jnp.maximum(
        jnp.dot(h1cat, w2_ref[...], preferred_element_type=jnp.float32),
        0.0).astype(w3_ref.dtype)                              # (TH, W*P)

    # conv3 + residual add (shortcut rows sliced only here) + final ReLU.
    h3 = jnp.dot(h2, w3_ref[...], preferred_element_type=jnp.float32)
    o_ref[...] = jnp.maximum(h3 + m1[1:TH + 1, :SC], 0.0).astype(o_ref.dtype)


def bottleneck_ot(x_nchw, w1, w2, w3, ws, *, row_tile=None,
                  compute_dtype=jnp.bfloat16, out_dtype=jnp.float32,
                  packed_output=False):
    """BottleneckOT forward.

    x_nchw: (N, Cin, H, W).  Returns (N, 4P, H, W) in `out_dtype` by default,
    or the lane-dense packed (N, H, W*4P) slab when packed_output=True (use
    packed_output=True + out_dtype=bf16 when chaining blocks to skip the NCHW
    transpose and halve writeback).
    """
    N, Cin, H, W = x_nchw.shape
    P = w1.shape[1]
    Cout = w3.shape[1]
    Hp, Wp = H + 2, W + 2
    TH = _pick_row_tile(H) if row_tile is None else row_tile
    assert H % TH == 0, "H must be divisible by the row tile"
    SC = W * Cout  # multiple of 128 -> unmasked stores (perf, not correctness)

    # Layout packing happens once, outside the kernel.
    x_nhwc = jnp.transpose(x_nchw, (0, 2, 3, 1))
    x_pad = jnp.pad(x_nhwc, ((0, 0), (1, 1), (1, 1), (0, 0)))
    x_packed = x_pad.reshape(N, Hp, Wp * Cin).astype(compute_dtype)

    w1s, w2c, w3b = _pack_weights(w1, w2, w3, ws, W, compute_dtype)

    kernel = functools.partial(_bottleneck_kernel, TH=TH, W=W, P=P, Cout=Cout)

    # Actual lowered MXU FLOPs (dense banded matmuls), not "useful" conv FLOPs.
    steps = N * (H // TH)
    flops = 2 * steps * ((TH + 2) * (Wp * Cin) * (SC + Wp * P)
                         + TH * (3 * Wp * P) * (W * P)
                         + TH * (W * P) * SC)
    bytes_accessed = (
        x_packed.size * x_packed.dtype.itemsize
        + N * H * SC * jnp.dtype(out_dtype).itemsize
        + (w1s.size + w2c.size + w3b.size) * jnp.dtype(compute_dtype).itemsize)

    # VMEM budget: ~3/4 of per-core capacity, capped at 112 MiB
    # (v5e/v6e: 128 MiB -> ~96 MiB; v7x: 64 MiB per TC -> ~48 MiB).
    try:
        vmem_cap = int(pltpu.get_tpu_info().vmem_capacity_bytes)
    except Exception:  # conservative fallback (safe on every chip)
        vmem_cap = 64 * 1024 * 1024
    vmem_limit = int(min((vmem_cap * 3) // 4, 112 * 1024 * 1024))

    def _in_specs(weight_mode):
        wkw = {} if weight_mode is None else {"pipeline_mode": weight_mode}
        return [
            # One padded image stays VMEM-resident while its row tiles run.
            pl.BlockSpec((None, Hp, Wp * Cin), lambda n, r: (n, 0, 0)),
            # Weights: constant index maps -> fetched once, stay resident;
            # single-buffered when supported (halves weight VMEM footprint).
            pl.BlockSpec((Wp * Cin, SC + Wp * P), lambda n, r: (0, 0), **wkw),
            pl.BlockSpec((3 * Wp * P, W * P), lambda n, r: (0, 0), **wkw),
            pl.BlockSpec((W * P, SC), lambda n, r: (0, 0), **wkw),
        ]

    def _run(weight_mode):
        return pl.pallas_call(
            kernel,
            out_shape=jax.ShapeDtypeStruct((N, H, SC), out_dtype),
            grid=(N, H // TH),
            in_specs=_in_specs(weight_mode),
            out_specs=pl.BlockSpec((None, TH, SC), lambda n, r: (n, r, 0)),
            compiler_params=pltpu.CompilerParams(
                # Both axes independent -> megacore/2-TC splittable (v7x).
                dimension_semantics=("parallel", "parallel"),
                vmem_limit_bytes=vmem_limit),
            cost_estimate=pl.CostEstimate(
                flops=flops, transcendentals=0, bytes_accessed=bytes_accessed),
        )(x_packed, w1s, w2c, w3b)

    try:
        out_packed = _run(pl.Buffered(1))   # single-buffer resident weights
    except Exception:
        out_packed = _run(None)             # fall back to default pipelining

    if packed_output:
        return out_packed                    # (N, H, W*Cout), lane-dense
    out_nhwc = out_packed.reshape(N, H, W, Cout)
    return jnp.transpose(out_nhwc, (0, 3, 1, 2))


def reference_ot(x_nchw, w1, w2, w3, ws, compute_dtype=jnp.bfloat16):
    """Plain-JAX reference mirroring the kernel's bf16-in / f32-accumulate math."""
    x = jnp.transpose(x_nchw, (0, 2, 3, 1))
    N, H, W, Cin = x.shape
    P = w1.shape[1]
    Cout = w3.shape[1]

    def mm(a, b):
        return jax.lax.dot(a.astype(compute_dtype), b.astype(compute_dtype),
                           preferred_element_type=jnp.float32)

    x2 = x.reshape(N * H * W, Cin)
    h1 = jax.nn.relu(mm(x2, w1)).reshape(N, H, W, P)
    h1p = jnp.pad(h1, ((0, 0), (1, 1), (1, 1), (0, 0)))
    acc = jnp.zeros((N * H * W, P), jnp.float32)
    for dy in range(3):
        for dx in range(3):
            win = h1p[:, dy:dy + H, dx:dx + W, :].reshape(N * H * W, P)
            acc = acc + mm(win, w2[dy, dx])
    h2 = jax.nn.relu(acc)
    h3 = mm(h2, w3)
    sc = mm(x2, ws)
    out = jax.nn.relu(h3 + sc).reshape(N, H, W, Cout)
    return jnp.transpose(out, (0, 3, 1, 2))


if __name__ == "__main__":
    # Small shapes consistent with the module: in_planes=8, planes=4 -> 16 out ch.
    N, Cin, H, W = 2, 8, 16, 16
    planes = 4
    Cout = EXPANSION * planes

    key = jax.random.PRNGKey(0)
    kx, k1, k2, k3, ks = jax.random.split(key, 5)

    x = jax.random.normal(kx, (N, Cin, H, W), dtype=jnp.float32)
    # Weight layouts (vs PyTorch conv weight (co, ci, kh, kw)):
    #   w1 = conv1.weight[..., 0, 0].T            -> (Cin, P)
    #   w2 = conv2.weight.transpose(2, 3, 1, 0)   -> (3, 3, P, P) [dy, dx, ci, co]
    #   w3 = conv3.weight[..., 0, 0].T            -> (P, 4P)
    #   ws = shortcut conv weight[..., 0, 0].T    -> (Cin, 4P)
    w1 = jax.random.normal(k1, (Cin, planes), dtype=jnp.float32) * 0.1
    w2 = jax.random.normal(k2, (3, 3, planes, planes), dtype=jnp.float32) * 0.1
    w3 = jax.random.normal(k3, (planes, Cout), dtype=jnp.float32) * 0.1
    ws = jax.random.normal(ks, (Cin, Cout), dtype=jnp.float32) * 0.1

    out = bottleneck_ot(x, w1, w2, w3, ws)
    jax.block_until_ready(out)

    ref = reference_ot(x, w1, w2, w3, ws)
    assert out.shape == (N, Cout, H, W), out.shape
    err = float(jnp.max(jnp.abs(out - ref)))
    assert err < 1e-2, err

    print("KERNEL_OK")
</pallas_src>

<mosaic_0001>
module attributes {stable_mosaic.version = 11 : i64} {
  func.func @_bottleneck_kernel(%arg0: i32, %arg1: i32, %arg2: memref<1x18x144xbf16, #tpu.memory_space<vmem>>, %arg3: memref<144x328xbf16, #tpu.memory_space<vmem>>, %arg4: memref<216x64xbf16, #tpu.memory_space<vmem>>, %arg5: memref<64x256xbf16, #tpu.memory_space<vmem>>, %arg6: memref<1x16x256xf32, #tpu.memory_space<vmem>>) attributes {dimension_semantics = [#tpu.dimension_semantics<parallel>, #tpu.dimension_semantics<parallel>], iteration_bounds = array<i64: 2, 1>, scalar_prefetch = 0 : i64, scratch_operands = 0 : i64, tpu.core_type = #tpu.core_type<tc>, window_params = [{transform_indices = @transform_0, window_bounds = array<i64: 1, 18, 144>}, {pipeline_mode = #tpu.pipeline_mode<synchronous>, transform_indices = @transform_1, window_bounds = array<i64: 144, 328>}, {pipeline_mode = #tpu.pipeline_mode<synchronous>, transform_indices = @transform_2, window_bounds = array<i64: 216, 64>}, {pipeline_mode = #tpu.pipeline_mode<synchronous>, transform_indices = @transform_3, window_bounds = array<i64: 64, 256>}, {transform_indices = @transform_4, window_bounds = array<i64: 1, 16, 256>}]} {
    %c16_i32 = arith.constant 16 : i32
    %0 = arith.muli %arg1, %c16_i32 : i32
    %1 = tpu.assume_multiple %0, 16 : i32
    %c0 = arith.constant 0 : index
    %2 = arith.index_cast %1 : i32 to index
    %c0_0 = arith.constant 0 : index
    %3 = vector.load %arg2[%c0, %2, %c0_0] : memref<1x18x144xbf16, #tpu.memory_space<vmem>>, vector<1x18x144xbf16>
    %4 = vector.shape_cast %3 : vector<1x18x144xbf16> to vector<18x144xbf16>
    %c0_1 = arith.constant 0 : index
    %c0_2 = arith.constant 0 : index
    %5 = vector.load %arg3[%c0_1, %c0_2] : memref<144x328xbf16, #tpu.memory_space<vmem>>, vector<144x328xbf16>
    %cst = arith.constant dense<0.000000e+00> : vector<18x328xf32>
    %6 = tpu.matmul %4, %5, %cst {dimension_numbers = #tpu.dot_dimension_numbers<[1], [0], [0], [1], [0, 0, 1, 1], [], []>} : vector<18x144xbf16>, vector<144x328xbf16>, vector<18x328xf32> -> vector<18x328xf32>
    %7 = vector.extract_strided_slice %6 {offsets = [0, 256], sizes = [18, 72], strides = [1, 1]} : vector<18x328xf32> to vector<18x72xf32>
    %cst_3 = arith.constant 0.000000e+00 : f32
    %8 = vector.broadcast %cst_3 : f32 to vector<18x72xf32>
    %9 = arith.maximumf %7, %8 : vector<18x72xf32>
    %10 = arith.truncf %9 : vector<18x72xf32> to vector<18x72xbf16>
    %11 = vector.extract_strided_slice %10 {offsets = [0, 0], sizes = [16, 72], strides = [1, 1]} : vector<18x72xbf16> to vector<16x72xbf16>
    %12 = vector.extract_strided_slice %10 {offsets = [1, 0], sizes = [16, 72], strides = [1, 1]} : vector<18x72xbf16> to vector<16x72xbf16>
    %13 = vector.extract_strided_slice %10 {offsets = [2, 0], sizes = [16, 72], strides = [1, 1]} : vector<18x72xbf16> to vector<16x72xbf16>
    %14 = tpu.concatenate %11, %12, %13 in 1 : vector<16x72xbf16>, vector<16x72xbf16>, vector<16x72xbf16> -> vector<16x216xbf16>
    %c0_4 = arith.constant 0 : index
    %c0_5 = arith.constant 0 : index
    %15 = vector.load %arg4[%c0_4, %c0_5] : memref<216x64xbf16, #tpu.memory_space<vmem>>, vector<216x64xbf16>
    %cst_6 = arith.constant dense<0.000000e+00> : vector<16x64xf32>
    %16 = tpu.matmul %14, %15, %cst_6 {dimension_numbers = #tpu.dot_dimension_numbers<[1], [0], [0], [1], [0, 0, 1, 1], [], []>} : vector<16x216xbf16>, vector<216x64xbf16>, vector<16x64xf32> -> vector<16x64xf32>
    %cst_7 = arith.constant 0.000000e+00 : f32
    %17 = vector.broadcast %cst_7 : f32 to vector<16x64xf32>
    %18 = arith.maximumf %16, %17 : vector<16x64xf32>
    %19 = arith.truncf %18 : vector<16x64xf32> to vector<16x64xbf16>
    %c0_8 = arith.constant 0 : index
    %c0_9 = arith.constant 0 : index
    %20 = vector.load %arg5[%c0_8, %c0_9] : memref<64x256xbf16, #tpu.memory_space<vmem>>, vector<64x256xbf16>
    %cst_10 = arith.constant dense<0.000000e+00> : vector<16x256xf32>
    %21 = tpu.matmul %19, %20, %cst_10 {dimension_numbers = #tpu.dot_dimension_numbers<[1], [0], [0], [1], [0, 0, 1, 1], [], []>} : vector<16x64xbf16>, vector<64x256xbf16>, vector<16x256xf32> -> vector<16x256xf32>
    %22 = vector.extract_strided_slice %6 {offsets = [1, 0], sizes = [16, 256], strides = [1, 1]} : vector<18x328xf32> to vector<16x256xf32>
    %23 = arith.addf %21, %22 : vector<16x256xf32>
    %cst_11 = arith.constant 0.000000e+00 : f32
    %24 = vector.broadcast %cst_11 : f32 to vector<16x256xf32>
    %25 = arith.maximumf %23, %24 : vector<16x256xf32>
    %c0_12 = arith.constant 0 : index
    %c0_13 = arith.constant 0 : index
    %c0_14 = arith.constant 0 : index
    %26 = vector.load %arg6[%c0_12, %c0_13, %c0_14] : memref<1x16x256xf32, #tpu.memory_space<vmem>>, vector<1x16x256xf32>
    %27 = vector.shape_cast %26 : vector<1x16x256xf32> to vector<16x256xf32>
    %28 = vector.shape_cast %25 : vector<16x256xf32> to vector<1x16x256xf32>
    tpu.vector_store %arg6[%c0_12, %c0_13, %c0_14], %28 {strides = array<i32>} : memref<1x16x256xf32, #tpu.memory_space<vmem>>, vector<1x16x256xf32>,
    return
  }
  func.func @transform_0(%arg0: i32, %arg1: i32) -> (i32, i32, i32) {
    %c0_i32 = arith.constant 0 : i32
    %c0_i32_0 = arith.constant 0 : i32
    %c0_i32_1 = arith.constant 0 : i32
    return %arg0, %c0_i32, %c0_i32_0 : i32, i32, i32
  }
  func.func @transform_1(%arg0: i32, %arg1: i32) -> (i32, i32) {
    %c0_i32 = arith.constant 0 : i32
    %c0_i32_0 = arith.constant 0 : i32
    %c0_i32_1 = arith.constant 0 : i32
    return %c0_i32, %c0_i32_0 : i32, i32
  }
  func.func @transform_2(%arg0: i32, %arg1: i32) -> (i32, i32) {
    %c0_i32 = arith.constant 0 : i32
    %c0_i32_0 = arith.constant 0 : i32
    %c0_i32_1 = arith.constant 0 : i32
    return %c0_i32, %c0_i32_0 : i32, i32
  }
  func.func @transform_3(%arg0: i32, %arg1: i32) -> (i32, i32) {
    %c0_i32 = arith.constant 0 : i32
    %c0_i32_0 = arith.constant 0 : i32
    %c0_i32_1 = arith.constant 0 : i32
    return %c0_i32, %c0_i32_0 : i32, i32
  }
  func.func @transform_4(%arg0: i32, %arg1: i32) -> (i32, i32, i32) {
    %c0_i32 = arith.constant 0 : i32
    %c0_i32_0 = arith.constant 0 : i32
    return %arg0, %arg1, %c0_i32 : i32, i32, i32
  }
}

module attributes {stable_mosaic.version = 11 : i64} {
  func.func @_bottleneck_kernel(%arg0: i32, %arg1: i32, %arg2: memref<1x18x144xbf16, #tpu.memory_space<vmem>>, %arg3: memref<144x328xbf16, #tpu.memory_space<vmem>>, %arg4: memref<216x64xbf16, #tpu.memory_space<vmem>>, %arg5: memref<64x256xbf16, #tpu.memory_space<vmem>>, %arg6: memref<1x16x256xf32, #tpu.memory_space<vmem>>) attributes {dimension_semantics = [#tpu.dimension_semantics<parallel>, #tpu.dimension_semantics<parallel>], iteration_bounds = array<i64: 2, 1>, scalar_prefetch = 0 : i64, scratch_operands = 0 : i64, tpu.core_type = #tpu.core_type<tc>, window_params = [{transform_indices = @transform_0, window_bounds = array<i64: 1, 18, 144>}, {pipeline_mode = #tpu.pipeline_mode<synchronous>, transform_indices = @transform_1, window_bounds = array<i64: 144, 328>}, {pipeline_mode = #tpu.pipeline_mode<synchronous>, transform_indices = @transform_2, window_bounds = array<i64: 216, 64>}, {pipeline_mode = #tpu.pipeline_mode<synchronous>, transform_indices = @transform_3, window_bounds = array<i64: 64, 256>}, {transform_indices = @transform_4, window_bounds = array<i64: 1, 16, 256>}]} {
    %c16_i32 = arith.constant 16 : i32
    %0 = arith.muli %arg1, %c16_i32 : i32
    %1 = tpu.assume_multiple %0, 16 : i32
    %c0 = arith.constant 0 : index
    %2 = arith.index_cast %1 : i32 to index
    %c0_0 = arith.constant 0 : index
    %3 = vector.load %arg2[%c0, %2, %c0_0] : memref<1x18x144xbf16, #tpu.memory_space<vmem>>, vector<1x18x144xbf16>
    %4 = vector.shape_cast %3 : vector<1x18x144xbf16> to vector<18x144xbf16>
    %c0_1 = arith.constant 0 : index
    %c0_2 = arith.constant 0 : index
    %5 = vector.load %arg3[%c0_1, %c0_2] : memref<144x328xbf16, #tpu.memory_space<vmem>>, vector<144x328xbf16>
    %cst = arith.constant dense<0.000000e+00> : vector<18x328xf32>
    %6 = tpu.matmul %4, %5, %cst {dimension_numbers = #tpu.dot_dimension_numbers<[1], [0], [0], [1], [0, 0, 1, 1], [], []>} : vector<18x144xbf16>, vector<144x328xbf16>, vector<18x328xf32> -> vector<18x328xf32>
    %7 = vector.extract_strided_slice %6 {offsets = [0, 256], sizes = [18, 72], strides = [1, 1]} : vector<18x328xf32> to vector<18x72xf32>
    %cst_3 = arith.constant 0.000000e+00 : f32
    %8 = vector.broadcast %cst_3 : f32 to vector<18x72xf32>
    %9 = arith.maximumf %7, %8 : vector<18x72xf32>
    %10 = arith.truncf %9 : vector<18x72xf32> to vector<18x72xbf16>
    %11 = vector.extract_strided_slice %10 {offsets = [0, 0], sizes = [16, 72], strides = [1, 1]} : vector<18x72xbf16> to vector<16x72xbf16>
    %12 = vector.extract_strided_slice %10 {offsets = [1, 0], sizes = [16, 72], strides = [1, 1]} : vector<18x72xbf16> to vector<16x72xbf16>
    %13 = vector.extract_strided_slice %10 {offsets = [2, 0], sizes = [16, 72], strides = [1, 1]} : vector<18x72xbf16> to vector<16x72xbf16>
    %14 = tpu.concatenate %11, %12, %13 in 1 : vector<16x72xbf16>, vector<16x72xbf16>, vector<16x72xbf16> -> vector<16x216xbf16>
    %c0_4 = arith.constant 0 : index
    %c0_5 = arith.constant 0 : index
    %15 = vector.load %arg4[%c0_4, %c0_5] : memref<216x64xbf16, #tpu.memory_space<vmem>>, vector<216x64xbf16>
    %cst_6 = arith.constant dense<0.000000e+00> : vector<16x64xf32>
    %16 = tpu.matmul %14, %15, %cst_6 {dimension_numbers = #tpu.dot_dimension_numbers<[1], [0], [0], [1], [0, 0, 1, 1], [], []>} : vector<16x216xbf16>, vector<216x64xbf16>, vector<16x64xf32> -> vector<16x64xf32>
    %cst_7 = arith.constant 0.000000e+00 : f32
    %17 = vector.broadcast %cst_7 : f32 to vector<16x64xf32>
    %18 = arith.maximumf %16, %17 : vector<16x64xf32>
    %19 = arith.truncf %18 : vector<16x64xf32> to vector<16x64xbf16>
    %c0_8 = arith.constant 0 : index
    %c0_9 = arith.constant 0 : index
    %20 = vector.load %arg5[%c0_8, %c0_9] : memref<64x256xbf16, #tpu.memory_space<vmem>>, vector<64x256xbf16>
    %cst_10 = arith.constant dense<0.000000e+00> : vector<16x256xf32>
    %21 = tpu.matmul %19, %20, %cst_10 {dimension_numbers = #tpu.dot_dimension_numbers<[1], [0], [0], [1], [0, 0, 1, 1], [], []>} : vector<16x64xbf16>, vector<64x256xbf16>, vector<16x256xf32> -> vector<16x256xf32>
    %22 = vector.extract_strided_slice %6 {offsets = [1, 0], sizes = [16, 256], strides = [1, 1]} : vector<18x328xf32> to vector<16x256xf32>
    %23 = arith.addf %21, %22 : vector<16x256xf32>
    %cst_11 = arith.constant 0.000000e+00 : f32
    %24 = vector.broadcast %cst_11 : f32 to vector<16x256xf32>
    %25 = arith.maximumf %23, %24 : vector<16x256xf32>
    %c0_12 = arith.constant 0 : index
    %c0_13 = arith.constant 0 : index
    %c0_14 = arith.constant 0 : index
    %26 = vector.load %arg6[%c0_12, %c0_13, %c0_14] : memref<1x16x256xf32, #tpu.memory_space<vmem>>, vector<1x16x256xf32>
    %27 = vector.shape_cast %26 : vector<1x16x256xf32> to vector<16x256xf32>
    %28 = vector.shape_cast %25 : vector<16x256xf32> to vector<1x16x256xf32>
    tpu.vector_store %arg6[%c0_12, %c0_13, %c0_14], %28 {strides = array<i32>} : memref<1x16x256xf32, #tpu.memory_space<vmem>>, vector<1x16x256xf32>,
    return
  }
  func.func @transform_0(%arg0: i32, %arg1: i32) -> (i32, i32, i32) {
    %c0_i32 = arith.constant 0 : i32
    %c0_i32_0 = arith.constant 0 : i32
    %c0_i32_1 = arith.constant 0 : i32
    return %arg0, %c0_i32, %c0_i32_0 : i32, i32, i32
  }
  func.func @transform_1(%arg0: i32, %arg1: i32) -> (i32, i32) {
    %c0_i32 = arith.constant 0 : i32
    %c0_i32_0 = arith.constant 0 : i32
    %c0_i32_1 = arith.constant 0 : i32
    return %c0_i32, %c0_i32_0 : i32, i32
  }
  func.func @transform_2(%arg0: i32, %arg1: i32) -> (i32, i32) {
    %c0_i32 = arith.constant 0 : i32
    %c0_i32_0 = arith.constant 0 : i32
    %c0_i32_1 = arith.constant 0 : i32
    return %c0_i32, %c0_i32_0 : i32, i32
  }
  func.func @transform_3(%arg0: i32, %arg1: i32) -> (i32, i32) {
    %c0_i32 = arith.constant 0 : i32
    %c0_i32_0 = arith.constant 0 : i32
    %c0_i32_1 = arith.constant 0 : i32
    return %c0_i32, %c0_i32_0 : i32, i32
  }
  func.func @transform_4(%arg0: i32, %arg1: i32) -> (i32, i32, i32) {
    %c0_i32 = arith.constant 0 : i32
    %c0_i32_0 = arith.constant 0 : i32
    return %arg0, %arg1, %c0_i32 : i32, i32, i32
  }
}

</mosaic_0001>

<bundles_post_ra>
// kernel: tpu_custom_call.1
= control target key start
LH: loop header
LB: loop body
LE: loop exit
PB: predicated region body
PF: predicated region fallthrough
CT: control target
= control target key end

     0   :  { %9 = vsyncpa [#allocation3], 0  ;;  %s1641_s0 = inlined_call_operand.vmem [shape: bf16[2,18,144], index: 0, kind: input, shape index: {}]   ;;  %s1642_s1 = inlined_call_operand.vmem [shape: bf16[144,328], index: 1, kind: input, shape index: {}]   ;;  %s1643_s2 = inlined_call_operand.vmem [shape: bf16[216,64], index: 2, kind: input, shape index: {}]   ;;  %s1644_s3 = inlined_call_operand.hbm [shape: bf16[64,256], index: 3, kind: input, shape index: {}]   ;;  %s1645_s4 = inlined_call_operand.hbm [shape: f32[2,16,256], index: 4, kind: output, shape index: {}]  }
   0x1   :  { %10 = vsyncpa [#allocation4], 0 }
   0x2   :  { %12 = vsyncpa [#allocation4 + $0x1], 0  ;;  %s1317_s15 = smov 0   ;;  %s1319_s16 = smov 0  }
   0x3   :  { %s1321_s17 = smov 0   ;;  %s1323_s18 = smov 0  }
   0x4   :  { %s1325_s19 = smov 0   ;;  %s1327_s20 = smov 0  }
   0x5 LB: > { %s958_s21 = sadd.s32 4294967295, %s1282_s20   ;;  %s959_s22 = sadd.s32 4294967294, %s1282_s20   ;;  %s1282_s20 = sphi %s1327_s20, %s18_s20   ;;  %s1278_s19 = sphi %s1325_s19, %s1663_s19   ;;  %s1274_s18 = sphi %s1323_s18, %s1662_s18   ;;  %s1270_s17 = sphi %s1321_s17, %s1661_s17   ;;  %s1266_s16 = sphi %s1319_s16, %s1660_s16   ;;  %s1262_s15 = sphi %s1317_s15, %s1659_s15  }
   0x6   : > { %s30_s23 = sadd.s32 1, %s1278_s19  ;;  %s128_s24 = sadd.s32 1, %s1270_s17 }
   0x7   : > { %p32_p0 = scmp.ge.s32.totalorder %s30_s23, 2  ;;  %p138_p1 = scmp.ne.s32.totalorder %s1270_s17, %s1266_s16 }
   0x8   : > { %p139_p2 = scmp.eq.s32.totalorder %s958_s21, 1  ;;  %p144_p3 = scmp.ne.s32.totalorder %s1266_s16, %s1262_s15 }
   0x9   : > { %s1665_s23 = smov (%p32_p0, %s30_s23), 0  ;;  %p145_p5 = scmp.eq.s32.totalorder %s959_s22, 1 }
   0xa   : > { %p1357_p4 = por %p139_p2, %p138_p1  ;;  %s123_s26 = ssub.s32 %s1278_s19, %s1665_s23 }
   0xb   : > { %p960_p6 = scmp.ge.s32.totalorder %s1282_s20, 1  ;;  %p126_p7 = scmp.eq.s32.totalorder %s123_s26, 0 }
   0xc   : > { %s1650_s25 = scalar_select %p1357_p4, 1, 0 }
   0xd   : > { %p1364_p8 = por %p145_p5, %p144_p3  ;;  %p152_p9 = scmp.lt.s32.totalorder %s1282_s20, 3 }
   0xe   : > { %s1370_s28 = scalar_select %p126_p7, %s1270_s17, %s128_s24  }
   0xf   : > { %s1651_s27 = scalar_select %p1364_p8, 1, 0 }
  0x10   : > { %p1372_p10 = pnand %p960_p6, %p152_p9  ;;  %p1376_p11 = scmp.eq.s32.totalorder %s958_s21, 0 }
  0x11   : > { %s1284_s5 = smov [#allocation2]   ;;  %s1172_s10 = scalar_lea.hbm %s1644_s3, 1024 }
  0x12   : > { %s1652_s29 = scalar_select %p1372_p10, 1, 0 }
  0x13   : > { %s1653_s30 = scalar_select %p1376_p11, 1, 0 }
  0x14   : > { %p1039_p12 = pneg %p1372_p10  ;;  %s170_s6 = sshll.u32 %s1284_s5, 4  ;;  %s171_s6 = int_to_ptr.vmem [resolvable:$true] %s170_s6 }
  0x15   : > { %p1173_p0 = scmp.ne.s32.totalorder %s1644_s3, %s1172_s10  ;;  %p1179_p5 = scmp.lt.u32.totalorder %s1172_s10, %s1644_s3 }
  0x16   : > { %p1384_p13 = pnand %p1376_p11, %p1039_p12 }
  0x18   : > { %p1174_p1 = pneg %p1384_p13 }
  0x1a   : > { %p1175_p2 = pnand %p1174_p1, %p1173_p0 }
  0x1c   : > { %p1176_p3 = pneg %p1175_p2 }
  0x1e   : > { %p1181_p6 = pnand %p1179_p5, %p1176_p3 }
  0x20   : > { %1184 = shalt.err (!%p1181_p6)
}
  0x21   : > { %s1185_s21 = scalar_lea.vmem %s171_s6, 1024  ;;  %p1193_p8 = scmp.lt.s32.totalorder %s171_s6, %s171_s6 }
  0x22   : > { %p1186_p7 = scmp.ne.s32.totalorder %s171_s6, %s1185_s21  ;;  %p1194_p4 = scmp.lt.s32.totalorder %s1185_s21, %s1185_s21 }
  0x24   : > { %p1188_p9 = pnand %p1186_p7, %p1174_p1  ;;  %p1195_p11 = por %p1194_p4, %p1193_p8 }
  0x26   : > { %p1189_p12 = pneg %p1188_p9 }
  0x28   : > { %p1196_p10 = pnand %p1195_p11, %p1189_p12 }
  0x2a   : > { %1199 = shalt.err (!%p1196_p10)
}
  0x2b   : > { %s1285_s22 = smov 128   ;;  %s1286_s24 = smov 8  }
  0x2c   : > { %1042 = dma.hbm_to_vmem [thread:$0]  (!%p1384_p13), %s1644_s3, 1024, %s171_s6, [#allocation3], %s1285_s22, %s1285_s22, %s1286_s24  }
  0x2d   : > { %p1655_p0 = scmp.ne.s32.totalorder %s1652_s29, 0 }
  0x2e   : > { %p1656_p2 = scmp.ne.s32.totalorder (!%p1655_p0), %s1653_s30, 0 }
  0x2f   : > { %194 = sbr.rel (%p1655_p0) target bundleno = 930 (0x3a2), region = 36 }
  0x36   : > { %1253 = dma.done.wait (%p1656_p2), [#allocation3], 1024  }
  0x37   : > { %1255 = vsyncadd (%p1656_p2), [#allocation3], 4294966272  ;;  %v1287_v0 = vmov 0   ;;  %p220_p4 = scmp.lt.s32.totalorder %s1274_s18, 1  ;;  %v1105_v1 = vld [vmem:[%s1642_s1 + $0x4] ss:$12 sps:$4 sm:$0xff]  }
  0x38   : > { %686 = vmatprep.subr.bf16.mxu0 %v1287_v0  ;;  %v1107_v2 = vld [vmem:[%s1642_s1] ss:$12 sps:$4 sm:$0xff]   ;;  %438 = vmatprep.subr.bf16.mxu1 %v1105_v1  ;;  %v1108_v3 = vld [vmem:[%s1642_s1 + $0x1c] ss:$12 sps:$4 sm:$0xff]   ;;  %v1110_v4 = vld [vmem:[%s1642_s1 + $0x18] ss:$12 sps:$4 sm:$0xff]  }
  0x39   : > { %s221_s30 = scalar_select %p220_p4, %s1274_s18, 1  ;;  %439 = vmatpush1.bf16.msra.mxu1 %v1107_v2  ;;  %v1111_v5 = vld [vmem:[%s1642_s1 + $0x34] ss:$12 sps:$4 sm:$0xff]   ;;  %v1113_v6 = vld [vmem:[%s1642_s1 + $0x30] ss:$12 sps:$4 sm:$0xff]   ;;  %vm431_vm0 = vcmask 130048  }
  0x3a   : > { %440 = vmatprep.subr.bf16.mxu1 %v1108_v3  ;;  %v1114_v7 = vld [vmem:[%s1642_s1 + $0x4c] ss:$12 sps:$4 sm:$0xff]   ;;  %v1116_v8 = vld [vmem:[%s1642_s1 + $0x48] ss:$12 sps:$4 sm:$0xff]   ;;  %v1117_v9 = vld [vmem:[%s1642_s1 + $0x64] ss:$12 sps:$4 sm:$0xff]  }
  0x3b   : > { %s1032_s21 = smul.u32 24, %s221_s30  ;;  %v1119_v11 = vld [vmem:[%s1642_s1 + $0x60] ss:$12 sps:$4 sm:$0xff]   ;;  %v1120_v12 = vld [vmem:[%s1642_s1 + $0x7c] ss:$12 sps:$4 sm:$0xff]   ;;  %v1148_v35 = vld [vmem:[%s1643_s2 + $0x10] sm:$0xff]  }
  0x3c   : > { %v1122_v13 = vld [vmem:[%s1642_s1 + $0x78] ss:$12 sps:$4 sm:$0xff]   ;;  %v1123_v14 = vld [vmem:[%s1642_s1 + $0x94] ss:$12 sps:$4 sm:$0xff]   ;;  %v1125_v15 = vld [vmem:[%s1642_s1 + $0x90] ss:$12 sps:$4 sm:$0xff]  }
  0x3d   : > { %441 = vmatpush1.bf16.msra.mxu1 %v1110_v4  ;;  %s224_s6 = scalar_lea.vmem %s1641_s0, %s1032_s21  ;;  %v1126_v16 = vld [vmem:[%s1642_s1 + $0xac] ss:$12 sps:$4 sm:$0xff]   ;;  %v1128_v17 = vld [vmem:[%s1642_s1 + $0xa8] ss:$12 sps:$4 sm:$0xff]   ;;  %v1129_v18 = vld [vmem:[%s1642_s1 + $0xc4] ss:$12 sps:$4 sm:$0xff]  }
  0x3e   : > { %442 = vmatprep.subr.bf16.mxu1 %v1111_v5  ;;  %v1134_v10 = vld [vmem:[%s224_s6 + $0x4] ss:$8 sps:$4 sm:$0xff]   ;;  %v235_v20 = vld [vmem:[%s224_s6 + $0x10] sm:$0x11]  ;;  %v1132_v21 = vld [vmem:[%s224_s6] ss:$8 sps:$4 sm:$0xff]  }
  0x3f   : > { %998 = vmatprep.mubr.msk.bf16.mxu1 %vm431_vm0, %v1134_v10  ;;  %v1131_v19 = vld [vmem:[%s1642_s1 + $0xc0] ss:$12 sps:$4 sm:$0xff]   ;;  %v1135_v22 = vld [vmem:[%s1642_s1 + $0x8] ss:$12 sps:$4 sm:$0xff]   ;;  %v970_v23 = vcombine.high %v235_v20, %v235_v20  ;;  %v969_v25 = vcombine.low %v235_v20, %v235_v20  ;;  %v1139_v26 = vld [vmem:[%s1642_s1 + $0x38] ss:$12 sps:$4 sm:$0xff]  }
  0x40   : > { %v1136_v24 = vld [vmem:[%s1642_s1 + $0x20] ss:$12 sps:$4 sm:$0xff]   ;;  %v1140_v27 = vld [vmem:[%s1642_s1 + $0x50] ss:$12 sps:$4 sm:$0xff]   ;;  %v1141_v28 = vld [vmem:[%s1642_s1 + $0x68] ss:$12 sps:$4 sm:$0xff]  }
  0x41   : > { %443 = vmatpush1.bf16.msra.mxu1 %v1113_v6  ;;  %v1142_v29 = vld [vmem:[%s1642_s1 + $0x80] ss:$12 sps:$4 sm:$0xff]   ;;  %v1143_v30 = vld [vmem:[%s1642_s1 + $0x98] ss:$12 sps:$4 sm:$0xff]   ;;  %v1144_v31 = vld [vmem:[%s1642_s1 + $0xb0] ss:$12 sps:$4 sm:$0xff]  }
  0x42   : > { %444 = vmatprep.subr.bf16.mxu1 %v1114_v7  ;;  %v1145_v32 = vld [vmem:[%s1642_s1 + $0xc8] ss:$12 sps:$4 sm:$0xff]   ;;  %v1146_v33 = vld [vmem:[%s1643_s2] sm:$0xff]   ;;  %v1149_v36 = vld [vmem:[%s1643_s2 + $0x18] sm:$0xff]   ;;  %vm559_vm1 = vcmask 1046528   ;;  %vm682_vm2 = vcmask 1043456  }
  0x43   : > { %687 = vmatpush1.bf16.msra.mxu0 %v1146_v33  ;;  %v1147_v34 = vld [vmem:[%s1643_s2 + $0x8] sm:$0xff]   ;;  %v1150_v37 = vld [vmem:[%s1643_s2 + $0x20] sm:$0xff]   ;;  %v1152_v39 = vld [vmem:[%s1643_s2 + $0x30] sm:$0xff]   ;;  %vm542_vm3 = vsmask.f32 7424  ;;  %s1288_s12 = smov 72  }
  0x44   : > { %688 = vmatprep.subr.bf16.mxu0 %v1287_v0  ;;  %v1151_v38 = vld [vmem:[%s1643_s2 + $0x28] sm:$0xff]   ;;  %v1153_v40 = vld [vmem:[%s1643_s2 + $0x38] sm:$0xff]   ;;  %v1154_v41 = vld [vmem:[%s1643_s2 + $0x40] sm:$0xff]   ;;  %s1289_s13 = smov 16   ;;  %vm679_vm4 = vcmask 719872   ;;  %vm565_vm5 = vcmask 588800  }
  0x45   : > { %445 = vmatpush1.bf16.msra.mxu1 %v1116_v8  ;;  %v1155_v42 = vld [vmem:[%s1643_s2 + $0x48] sm:$0xff]   ;;  %v1156_v43 = vld [vmem:[%s1643_s2 + $0x50] sm:$0xff]   ;;  %v1157_v44 = vld [vmem:[%s1643_s2 + $0x58] sm:$0xff]   ;;  %vm799_vm6 = vcmask 523264   ;;  %s217_s14 = sand.u32 1, %s1266_s16   ;;  %s1031_s6 = sshll.u32 %s1274_s18, 9 }
  0x46   : > { %446 = vmatprep.subr.bf16.mxu1 %v1117_v9  ;;  %v1158_v45 = vld [vmem:[%s1643_s2 + $0x60] sm:$0xff]   ;;  %v1159_v7 = vld [vmem:[%s1643_s2 + $0x68] ss:$0 sps:$4 sm:$0xff]   ;;  %s965_s21 = sshll.u32 %s217_s14, 5  ;;  %s1592_s7 = scalar_lea.hbm %s1645_s4, %s1031_s6 }
  0x47   : > { %689 = vmatpush1.bf16.msra.mxu0 %v1147_v34  ;;  %v684_v9 = vsel %vm682_vm2, %v1159_v7, 0  ;;  %v1163_v33 = vld [vmem:[#allocation2 + $0x10] ss:$8 sps:$4 sm:$0xff]   ;;  %v1168_v34 = vld [vmem:[#allocation2 + $0x24] ss:$8 sps:$4 sm:$0xff]   ;;  %s219_s22 = scalar_lea.vmem [#allocation5], %s965_s21 }
  0x48   : > { %690 = vmatprep.subr.bf16.mxu0 %v1287_v0  ;;  %s871_s24 = sshll.u32 %s219_s22, 4  ;;  %s1594_s18 = scalar_lea.sflag [#allocation4], %s217_s14  ;;  %s1587_s24 = int_to_ptr.vmem [resolvable:$true] %s871_s24 }
  0x49   : > { %447 = vmatpush1.bf16.msra.mxu1 %v1119_v11  ;;  %s1200_s8 = scalar_lea.vmem %s1587_s24, 512  ;;  %p1657_p10 = scmp.ne.s32.totalorder %s1650_s25, 0 }
  0x4a   : > { %448 = vmatprep.subr.bf16.mxu1 %v1120_v12  ;;  %p1201_p8 = scmp.ne.s32.totalorder %s1587_s24, %s1200_s8  ;;  %s1290_s9 = smov [#allocation5]  }
  0x4b   : > { %691 = vmatpush1.bf16.msra.mxu0 %v1148_v35  ;;  %v1166_v35 = vld [vmem:[#allocation2 + $0x20] ss:$8 sps:$4 sm:$0xff]   ;;  %s1204_s29 = sshll.u32 %s1290_s9, 4  ;;  %s1205_s29 = int_to_ptr.vmem [resolvable:$false] %s1204_s29 }
  0x4c   : > { %692 = vmatprep.subr.bf16.mxu0 %v1287_v0  ;;  %p1202_p11 = pnand %p1201_p8, %p1657_p10  ;;  %s1206_s10 = scalar_lea.vmem %s1205_s29, 1024 }
  0x4d   : > { %449 = vmatpush1.bf16.msra.mxu1 %v1122_v13  ;;  %p1207_p1 = scmp.lt.s32.totalorder %s1587_s24, %s1205_s29  ;;  %p1208_p3 = scmp.lt.s32.totalorder %s1206_s10, %s1200_s8 }
  0x4e   : > { %450 = vmatprep.subr.bf16.mxu1 %v1123_v14  ;;  %p1203_p13 = pneg %p1202_p11 }
  0x4f   : > { %693 = vmatpush1.bf16.msra.mxu0 %v1149_v36  ;;  %v1171_v36 = vld [vmem:[#allocation2 + $0x34] ss:$8 sps:$4 sm:$0xff]   ;;  %p1209_p5 = por %p1208_p3, %p1207_p1 }
  0x50   : > { %694 = vmatprep.subr.bf16.mxu0 %v1287_v0 }
  0x51   : > { %451 = vmatpush1.bf16.msra.mxu1 %v1125_v15  ;;  %p1210_p6 = pnand %p1209_p5, %p1203_p13 }
  0x52   : > { %452 = vmatprep.subr.bf16.mxu1 %v1126_v16 }
  0x53   : > { %695 = vmatpush1.bf16.msra.mxu0 %v1150_v37  ;;  %v1169_v37 = vld [vmem:[#allocation2 + $0x30] ss:$8 sps:$4 sm:$0xff]  }
  0x54   : > { %696 = vmatprep.subr.bf16.mxu0 %v1287_v0 }
  0x55   : > { %453 = vmatpush1.bf16.msra.mxu1 %v1128_v17 }
  0x56   : > { %454 = vmatprep.subr.bf16.mxu1 %v1129_v18  ;;  %v1162_v18 = vld [vmem:[#allocation2 + $0x4] ss:$8 sps:$4 sm:$0xff]  }
  0x57   : > { %697 = vmatpush1.bf16.msra.mxu0 %v1151_v38 }
  0x58   : > { %698 = vmatprep.subr.bf16.mxu0 %v1287_v0 }
  0x59   : > { %455 = vmatpush1.bf16.msra.mxu1 %v1131_v19 }
  0x5a   : > { %489 = vmatprep.subr.bf16.mxu1 %v1287_v0 }
  0x5b   : > { %699 = vmatpush1.bf16.msra.mxu0 %v1152_v39 }
  0x5c   : > { %471 = vmatmul.mubr.bf16.vlgmr.msra.gmra.mrb[0].mxu1 %v1132_v21  ;;  %700 = vmatprep.subr.bf16.mxu0 %v1287_v0 }
  0x5d   : > { %490 = vmatpush1.bf16.msra.mxu1 %v1135_v22  ;;  %999 = vmatprep.mubr.msk.bf16.mxu1 %vm431_vm0, %v970_v23 }
  0x5e   : > { %491 = vmatprep.subr.bf16.mxu1 %v1287_v0 }
  0x5f   : > { %701 = vmatpush1.bf16.msra.mxu0 %v1153_v40 }
  0x60   : > { %702 = vmatprep.subr.bf16.mxu0 %v1287_v0 }
  0x61   : > { %492 = vmatpush1.bf16.msra.mxu1 %v1136_v24 }
  0x62   : > { %493 = vmatprep.subr.bf16.mxu1 %v1287_v0 }
  0x63   : > { %703 = vmatpush1.bf16.msra.mxu0 %v1154_v41 }
  0x64   : > { %481 = vmatmul.mubr.bf16.gmra.mrb[4].mxu1 %v969_v25  ;;  %704 = vmatprep.subr.bf16.mxu0 %v1287_v0 }
  0x65   : > { %494 = vmatpush1.bf16.msra.mxu1 %v1139_v26  ;;  %1000 = vmatprep.mubr.msk.bf16.mxu1 %vm431_vm0, %v1134_v10 }
  0x66   : > { %495 = vmatprep.subr.bf16.mxu1 %v1287_v0 }
  0x67   : > { %705 = vmatpush1.bf16.msra.mxu0 %v1155_v42 }
  0x68   : > { %706 = vmatprep.subr.bf16.mxu0 %v1287_v0 }
  0x69   : > { %496 = vmatpush1.bf16.msra.mxu1 %v1140_v27 }
  0x6a   : > { %497 = vmatprep.subr.bf16.mxu1 %v1287_v0 }
  0x6b   : > { %707 = vmatpush1.bf16.msra.mxu0 %v1156_v43 }
  0x6c   : > { %708 = vmatprep.subr.bf16.mxu0 %v1287_v0 }
  0x6d   : > { %498 = vmatpush1.bf16.msra.mxu1 %v1141_v28 }
  0x6e   : > { %499 = vmatprep.subr.bf16.mxu1 %v1287_v0 }
  0x6f   : > { %709 = vmatpush1.bf16.msra.mxu0 %v1157_v44 }
  0x70   : > { %710 = vmatprep.subr.bf16.mxu0 %v1287_v0 }
  0x71   : > { %500 = vmatpush1.bf16.msra.mxu1 %v1142_v29  ;;  %v1160_v29 = vld [vmem:[#allocation2] ss:$8 sps:$4 sm:$0xff]  }
  0x72   : > { %501 = vmatprep.subr.bf16.mxu1 %v1287_v0 }
  0x73   : > { %711 = vmatpush1.bf16.msra.mxu0 %v1158_v45 }
  0x74   : > { %712 = vmatprep.subr.bf16.mxu0 %v1287_v0 }
  0x75   : > { %502 = vmatpush1.bf16.msra.mxu1 %v1143_v30 }
  0x76   : > { %503 = vmatprep.subr.bf16.mxu1 %v1287_v0 }
  0x77   : > { %713 = vmatpush1.bf16.msra.mxu0 %v684_v9 }
  0x78   : > { %803 = vmatprep.subr.bf16.mxu0 %v1162_v18 }
  0x79   : > { %504 = vmatpush1.bf16.msra.mxu1 %v1144_v31  ;;  %v1165_v31 = vld [vmem:[#allocation2 + $0x14] ss:$8 sps:$4 sm:$0xff]  }
  0x7a   : > { %505 = vmatprep.subr.bf16.mxu1 %v1287_v0 }
  0x7d   : > { %506 = vmatpush1.bf16.msra.mxu1 %v1145_v32 }
  0x80   : > { %522 = vmatmul.mubr.bf16.vlgmr.msra.gmra.mrb[8].mxu1 %v1132_v21 }
  0x81   : > { %1001 = vmatprep.mubr.msk.bf16.mxu1 %vm431_vm0, %v970_v23 }
  0x88   : > { %530 = vmatmul.mubr.bf16.gmra.mrb[12].mxu1 %v969_v25 }
 0x12f   : > { %v472_v46 = vpop.f32.mrb[0].mxu1 }
 0x130   : > { %v785_v47 = vrot.slane %v472_v46, 1  ;;  %v474_v48 = vpop.f32.mrb[1].mxu1 }
 0x131   : > { %v476_v49 = vpop.f32.mrb[2].mxu1  ;;  %v788_v52 = vrot.slane %v474_v48, 1 }
 0x132   : > { %v786_v50 = vrot.slane %v476_v49, 1  ;;  %v478_v51 = vpop.f32.mrb[3].mxu1 }
 0x133   : > { %v789_v53 = vrot.slane %v478_v51, 1 }
 0x134   : > { %v1563_v54 = vsel %vm559_vm1, %v785_v47, %v786_v50 }
 0x135   : > { %v1566_v55 = vsel %vm559_vm1, %v788_v52, %v789_v53 }
 0x137   : > { %v482_v56 = vpop.f32.mrb[4].mxu1 }
 0x138   : > { %v791_v57 = vrot.slane %v482_v56, 1  ;;  %v484_v58 = vpop.f32.mrb[5].mxu1 }
 0x139   : > { %v793_v59 = vrot.slane %v484_v58, 1  ;;  %v486_v60 = vpop.f32.mrb[6].mxu1 }
 0x13a   : > { %v487_v61 = vpop.f32.mrb[7].mxu1  ;;  %v1569_v62 = vsel %vm559_vm1, %v786_v50, %v791_v57 }
 0x13b   : > { %v1572_v63 = vsel %vm559_vm1, %v789_v53, %v793_v59 }
 0x153   : > { %v523_v1 = vpop.f32.mrb[8].mxu1 }
 0x154   : > { %v525_v2 = vpop.f32.mrb[9].mxu1  ;;  %v537_v4 = vmax.f32 %v523_v1, 0.0 }
 0x155   : > { %v526_v3 = vpop.f32.mrb[10].mxu1 }
 0x156   : > { %v538_v5 = vmax.f32 %v526_v3, 0.0  ;;  %v528_v6 = vpop.f32.mrb[11].mxu1 }
 0x158   : > { %v540_v8 = vpack.c.bf16 %v538_v5, %v537_v4 }
 0x15a   : > { %v546_v10 = vshll.u32 %v540_v8, 16  ;;  %v544_v20 = vshrl.u32 %v540_v8, 16  ;;  %v560_v25 = vrot.slane %v540_v8, 1 }
 0x15b   : > { %v531_v11 = vpop.f32.mrb[12].mxu1 }
 0x15c   : > { %v539_v12 = vmax.f32 %v531_v11, 0.0  ;;  %v533_v13 = vpop.f32.mrb[13].mxu1  ;;  %v548_v17 = vrot.slane %v546_v10, 1 }
 0x15d   : > { %v534_v14 = vpop.f32.mrb[14].mxu1 }
 0x15e   : > { %v541_v15 = vpack.c.bf16 %v539_v12, %v539_v12  ;;  %v535_v16 = vpop.f32.mrb[15].mxu1  ;;  %v549_v22 = vor.u32 %v548_v17, %v544_v20 }
 0x160   : > { %v551_v19 = vshll.u32 %v541_v15, 16  ;;  %v561_v23 = vrot.slane %v541_v15, 1 }
 0x162   : > { %v553_v21 = vrot.slane %v551_v19, 1  ;;  %v562_v26 = vsel %vm559_vm1, %v560_v25, %v561_v23 }
 0x164   : > { %v554_v24 = vsel %vm542_vm3, %v549_v22, %v553_v21 }
 0x165   : > { %555 = vrot.lane.b32.xlu0 %v554_v24, %s1288_s12 }
 0x169   : > { %563 = vrot.lane.b32.xlu0 %v562_v26, %s1289_s13 }
 0x1d7   : > { %v556_v27 = vpop.permute.xlu0 %555 }
 0x1d8   : > { %v567_v32 = vsel %vm565_vm5, %v540_v8, %v556_v27 }
 0x1db   : > { %v564_v28 = vpop.permute.xlu0 %563 }
 0x1dc   : > { %v570_v30 = vsel %vm431_vm0, %v556_v27, %v564_v28 }
 0x1dd   : > { %1016 = vmatprep.mubr.msk.bf16.mxu0 %vm679_vm4, %v570_v30 }
 0x1de   : > { %719 = vmatmul.mubr.bf16.vlgmr.msra.gmra.mrb[0].mxu0 %v567_v32 }
 0x1df   : > { %804 = vmatpush1.bf16.msra.mxu0 %v1160_v29  ;;  %835 = vmatprep.mubr.bf16.mxu0 %v1287_v0 }
 0x1e0   : > { %805 = vmatprep.subr.bf16.mxu0 %v1165_v31 }
 0x1e3   : > { %806 = vmatpush1.bf16.msra.mxu0 %v1163_v33 }
 0x1e4   : > { %807 = vmatprep.subr.bf16.mxu0 %v1168_v34 }
 0x1e7   : > { %808 = vmatpush1.bf16.msra.mxu0 %v1166_v35 }
 0x1e8   : > { %809 = vmatprep.subr.bf16.mxu0 %v1171_v36 }
 0x1eb   : > { %810 = vmatpush1.bf16.msra.mxu0 %v1169_v37 }
 0x2b1   : > { %v720_v38 = vpop.f32.mrb[0].mxu0 }
 0x2b2   : > { %v722_v39 = vpop.f32.mrb[1].mxu0  ;;  %v727_v41 = vmax.f32 %v720_v38, 0.0 }
 0x2b3   : > { %v723_v40 = vpop.f32.mrb[2].mxu0 }
 0x2b4   : > { %v728_v42 = vmax.f32 %v723_v40, 0.0  ;;  %v725_v43 = vpop.f32.mrb[3].mxu0 }
 0x2b6   : > { %v729_v0 = vpack.c.bf16 %v728_v42, %v727_v41 }
 0x2b8   : > { %1025 = vmatmul.mubr.msk.bf16.vlgmr.msra.gmra.mrb[4].mxu0 %vm799_vm6, %v729_v0 }
 0x38b   : > { %v837_v44 = vpop.f32.mrb[4].mxu0 }
 0x38c   : > { %v838_v45 = vadd.f32 %v837_v44, %v1563_v54  ;;  %v839_v46 = vpop.f32.mrb[5].mxu0 }
 0x38d   : > { %v840_v47 = vadd.f32 %v839_v46, %v1566_v55  ;;  %v841_v48 = vpop.f32.mrb[6].mxu0 }
 0x38e   : > { %v846_v49 = vmax.f32 %v838_v45, 0.0  ;;  %v842_v50 = vadd.f32 %v841_v48, %v1569_v62  ;;  %v843_v51 = vpop.f32.mrb[7].mxu0 }
 0x38f   : > { %v847_v52 = vmax.f32 %v840_v47, 0.0  ;;  %v844_v53 = vadd.f32 %v843_v51, %v1572_v63 }
 0x390   : > { %850 = vst [vmem:[%s219_s22] sm:$0xff] %v846_v49  ;;  %v848_v54 = vmax.f32 %v842_v50, 0.0 }
 0x391   : > { %851 = vst [vmem:[%s219_s22 + $0x8] sm:$0xff] %v847_v52  ;;  %v849_v56 = vmax.f32 %v844_v53, 0.0 }
 0x392   : > { %852 = vst [vmem:[%s219_s22 + $0x10] sm:$0xff] %v848_v54 }
 0x393   : > { %853 = vst [vmem:[%s219_s22 + $0x18] sm:$0xff] %v849_v56 }
 0x394   : > { %1213 = shalt.err (!%p1210_p6)
}
 0x395   : > { %s1214_s30 = scalar_lea.hbm %s1592_s7, 512  ;;  %s1218_s14 = scalar_lea.hbm %s1645_s4, 1024 }
 0x396   : > { %p1215_p7 = scmp.ne.s32.totalorder %s1592_s7, %s1214_s30  ;;  %p1219_p0 = scmp.lt.u32.totalorder %s1592_s7, %s1645_s4 }
 0x397   : > { %p1220_p2 = scmp.lt.u32.totalorder %s1218_s14, %s1214_s30  ;;  %p1222_p8 = scmp.lt.u32.totalorder %s1214_s30, %s1592_s7 }
 0x398   : > { %p1216_p9 = pnand %p1215_p7, %p1657_p10 }
 0x399   : > { %p1221_p4 = por %p1220_p2, %p1219_p0 }
 0x39a   : > { %p1217_p12 = pneg %p1216_p9 }
 0x39b   : > { %p1223_p11 = por %p1222_p8, %p1221_p4 }
 0x39d   : > { %p1224_p13 = pnand %p1223_p11, %p1217_p12 }
 0x39f   : > { %1227 = shalt.err (!%p1224_p13)
}
 0x3a0   : > { %s1291_s6 = smov 256  }
 0x3a1   : > { %1037 = dma.vmem_to_hbm [thread:$0]  (%p1657_p10), %s1587_s24, 512, %s1592_s7, %s1594_s18, %s1291_s6, %s1291_s6, %s1289_s13  }
 0x3a2 PF: > { %p1049_p1 = scmp.ge.s32.totalorder %s1282_s20, 2  ;;  %s886_s26 = sand.u32 1, %s1262_s15  }
 0x3a3   : > { %p1658_p3 = scmp.ne.s32.totalorder %s1651_s27, 0  ;;  %s887_s5 = scalar_lea.sflag [#allocation4], %s886_s26 }
 0x3a5   : > { %p1044_p5 = pnand %p1049_p1, %p1658_p3 }
 0x3a7   : > { %1257 = dma.done.wait (!%p1044_p5), %s887_s5, 512  }
 0x3a8   : > { %1259 = vsyncadd (!%p1044_p5), %s887_s5, 4294966784  ;;  %s18_s20 = sadd.s32 1, %s1282_s20   ;;  %s1659_s15 = smov %s1266_s16 }
 0x3a9   : > { %p15_p6 = scmp.ge.s32.totalorder %s18_s20, 4   ;;  %s1660_s16 = smov %s1270_s17 }
 0x3aa   : > { %s1661_s17 = smov %s1370_s28  ;;  %s1662_s18 = smov %s1278_s19 }
 0x3ab   : > { %s1663_s19 = smov %s1665_s23  ;;  %17 = sbr.rel (!%p15_p6) target bundleno = 5 (0x5), region = 77 }
 0x3b2   :  { %892 = vsyncpa [#allocation3], 1 }
 0x3b3   :  { %894 = vsyncpa [#allocation3 + $0x1], 1 }
 0x3b4   :  { %895 = vsyncpa [#allocation4], 1 }
 0x3b5   :  { %897 = vsyncpa [#allocation4 + $0x1], 1 }

// kernel: tpu_custom_call.1
= control target key start
LH: loop header
LB: loop body
LE: loop exit
PB: predicated region body
PF: predicated region fallthrough
CT: control target
= control target key end

     0   :  { %9 = vsyncpa [#allocation3], 0  ;;  %s1641_s0 = inlined_call_operand.vmem [shape: bf16[2,18,144], index: 0, kind: input, shape index: {}]   ;;  %s1642_s1 = inlined_call_operand.vmem [shape: bf16[144,328], index: 1, kind: input, shape index: {}]   ;;  %s1643_s2 = inlined_call_operand.vmem [shape: bf16[216,64], index: 2, kind: input, shape index: {}]   ;;  %s1644_s3 = inlined_call_operand.hbm [shape: bf16[64,256], index: 3, kind: input, shape index: {}]   ;;  %s1645_s4 = inlined_call_operand.hbm [shape: f32[2,16,256], index: 4, kind: output, shape index: {}]  }
   0x1   :  { %10 = vsyncpa [#allocation4], 0 }
   0x2   :  { %12 = vsyncpa [#allocation4 + $0x1], 0  ;;  %s1317_s15 = smov 0   ;;  %s1319_s16 = smov 0  }
   0x3   :  { %s1321_s17 = smov 0   ;;  %s1323_s18 = smov 0  }
   0x4   :  { %s1325_s19 = smov 0   ;;  %s1327_s20 = smov 0  }
   0x5 LB: > { %s958_s21 = sadd.s32 4294967295, %s1282_s20   ;;  %s959_s22 = sadd.s32 4294967294, %s1282_s20   ;;  %s1282_s20 = sphi %s1327_s20, %s18_s20   ;;  %s1278_s19 = sphi %s1325_s19, %s1663_s19   ;;  %s1274_s18 = sphi %s1323_s18, %s1662_s18   ;;  %s1270_s17 = sphi %s1321_s17, %s1661_s17   ;;  %s1266_s16 = sphi %s1319_s16, %s1660_s16   ;;  %s1262_s15 = sphi %s1317_s15, %s1659_s15  }
   0x6   : > { %s30_s23 = sadd.s32 1, %s1278_s19  ;;  %s128_s24 = sadd.s32 1, %s1270_s17 }
   0x7   : > { %p32_p0 = scmp.ge.s32.totalorder %s30_s23, 2  ;;  %p138_p1 = scmp.ne.s32.totalorder %s1270_s17, %s1266_s16 }
   0x8   : > { %p139_p2 = scmp.eq.s32.totalorder %s958_s21, 1  ;;  %p144_p3 = scmp.ne.s32.totalorder %s1266_s16, %s1262_s15 }
   0x9   : > { %s1665_s23 = smov (%p32_p0, %s30_s23), 0  ;;  %p145_p5 = scmp.eq.s32.totalorder %s959_s22, 1 }
   0xa   : > { %p1357_p4 = por %p139_p2, %p138_p1  ;;  %s123_s26 = ssub.s32 %s1278_s19, %s1665_s23 }
   0xb   : > { %p960_p6 = scmp.ge.s32.totalorder %s1282_s20, 1  ;;  %p126_p7 = scmp.eq.s32.totalorder %s123_s26, 0 }
   0xc   : > { %s1650_s25 = scalar_select %p1357_p4, 1, 0 }
   0xd   : > { %p1364_p8 = por %p145_p5, %p144_p3  ;;  %p152_p9 = scmp.lt.s32.totalorder %s1282_s20, 3 }
   0xe   : > { %s1370_s28 = scalar_select %p126_p7, %s1270_s17, %s128_s24  }
   0xf   : > { %s1651_s27 = scalar_select %p1364_p8, 1, 0 }
  0x10   : > { %p1372_p10 = pnand %p960_p6, %p152_p9  ;;  %p1376_p11 = scmp.eq.s32.totalorder %s958_s21, 0 }
  0x11   : > { %s1284_s5 = smov [#allocation2]   ;;  %s1172_s10 = scalar_lea.hbm %s1644_s3, 1024 }
  0x12   : > { %s1652_s29 = scalar_select %p1372_p10, 1, 0 }
  0x13   : > { %s1653_s30 = scalar_select %p1376_p11, 1, 0 }
  0x14   : > { %p1039_p12 = pneg %p1372_p10  ;;  %s170_s6 = sshll.u32 %s1284_s5, 4  ;;  %s171_s6 = int_to_ptr.vmem [resolvable:$true] %s170_s6 }
  0x15   : > { %p1173_p0 = scmp.ne.s32.totalorder %s1644_s3, %s1172_s10  ;;  %p1179_p5 = scmp.lt.u32.totalorder %s1172_s10, %s1644_s3 }
  0x16   : > { %p1384_p13 = pnand %p1376_p11, %p1039_p12 }
  0x18   : > { %p1174_p1 = pneg %p1384_p13 }
  0x1a   : > { %p1175_p2 = pnand %p1174_p1, %p1173_p0 }
  0x1c   : > { %p1176_p3 = pneg %p1175_p2 }
  0x1e   : > { %p1181_p6 = pnand %p1179_p5, %p1176_p3 }
  0x20   : > { %1184 = shalt.err (!%p1181_p6)
}
  0x21   : > { %s1185_s21 = scalar_lea.vmem %s171_s6, 1024  ;;  %p1193_p8 = scmp.lt.s32.totalorder %s171_s6, %s171_s6 }
  0x22   : > { %p1186_p7 = scmp.ne.s32.totalorder %s171_s6, %s1185_s21  ;;  %p1194_p4 = scmp.lt.s32.totalorder %s1185_s21, %s1185_s21 }
  0x24   : > { %p1188_p9 = pnand %p1186_p7, %p1174_p1  ;;  %p1195_p11 = por %p1194_p4, %p1193_p8 }
  0x26   : > { %p1189_p12 = pneg %p1188_p9 }
  0x28   : > { %p1196_p10 = pnand %p1195_p11, %p1189_p12 }
  0x2a   : > { %1199 = shalt.err (!%p1196_p10)
}
  0x2b   : > { %s1285_s22 = smov 128   ;;  %s1286_s24 = smov 8  }
  0x2c   : > { %1042 = dma.hbm_to_vmem [thread:$0]  (!%p1384_p13), %s1644_s3, 1024, %s171_s6, [#allocation3], %s1285_s22, %s1285_s22, %s1286_s24  }
  0x2d   : > { %p1655_p0 = scmp.ne.s32.totalorder %s1652_s29, 0 }
  0x2e   : > { %p1656_p2 = scmp.ne.s32.totalorder (!%p1655_p0), %s1653_s30, 0 }
  0x2f   : > { %194 = sbr.rel (%p1655_p0) target bundleno = 930 (0x3a2), region = 36 }
  0x36   : > { %1253 = dma.done.wait (%p1656_p2), [#allocation3], 1024  }
  0x37   : > { %1255 = vsyncadd (%p1656_p2), [#allocation3], 4294966272  ;;  %v1287_v0 = vmov 0   ;;  %p220_p4 = scmp.lt.s32.totalorder %s1274_s18, 1  ;;  %v1105_v1 = vld [vmem:[%s1642_s1 + $0x4] ss:$12 sps:$4 sm:$0xff]  }
  0x38   : > { %686 = vmatprep.subr.bf16.mxu0 %v1287_v0  ;;  %v1107_v2 = vld [vmem:[%s1642_s1] ss:$12 sps:$4 sm:$0xff]   ;;  %438 = vmatprep.subr.bf16.mxu1 %v1105_v1  ;;  %v1108_v3 = vld [vmem:[%s1642_s1 + $0x1c] ss:$12 sps:$4 sm:$0xff]   ;;  %v1110_v4 = vld [vmem:[%s1642_s1 + $0x18] ss:$12 sps:$4 sm:$0xff]  }
  0x39   : > { %s221_s30 = scalar_select %p220_p4, %s1274_s18, 1  ;;  %439 = vmatpush1.bf16.msra.mxu1 %v1107_v2  ;;  %v1111_v5 = vld [vmem:[%s1642_s1 + $0x34] ss:$12 sps:$4 sm:$0xff]   ;;  %v1113_v6 = vld [vmem:[%s1642_s1 + $0x30] ss:$12 sps:$4 sm:$0xff]   ;;  %vm431_vm0 = vcmask 130048  }
  0x3a   : > { %440 = vmatprep.subr.bf16.mxu1 %v1108_v3  ;;  %v1114_v7 = vld [vmem:[%s1642_s1 + $0x4c] ss:$12 sps:$4 sm:$0xff]   ;;  %v1116_v8 = vld [vmem:[%s1642_s1 + $0x48] ss:$12 sps:$4 sm:$0xff]   ;;  %v1117_v9 = vld [vmem:[%s1642_s1 + $0x64] ss:$12 sps:$4 sm:$0xff]  }
  0x3b   : > { %s1032_s21 = smul.u32 24, %s221_s30  ;;  %v1119_v11 = vld [vmem:[%s1642_s1 + $0x60] ss:$12 sps:$4 sm:$0xff]   ;;  %v1120_v12 = vld [vmem:[%s1642_s1 + $0x7c] ss:$12 sps:$4 sm:$0xff]   ;;  %v1148_v35 = vld [vmem:[%s1643_s2 + $0x10] sm:$0xff]  }
  0x3c   : > { %v1122_v13 = vld [vmem:[%s1642_s1 + $0x78] ss:$12 sps:$4 sm:$0xff]   ;;  %v1123_v14 = vld [vmem:[%s1642_s1 + $0x94] ss:$12 sps:$4 sm:$0xff]   ;;  %v1125_v15 = vld [vmem:[%s1642_s1 + $0x90] ss:$12 sps:$4 sm:$0xff]  }
  0x3d   : > { %441 = vmatpush1.bf16.msra.mxu1 %v1110_v4  ;;  %s224_s6 = scalar_lea.vmem %s1641_s0, %s1032_s21  ;;  %v1126_v16 = vld [vmem:[%s1642_s1 + $0xac] ss:$12 sps:$4 sm:$0xff]   ;;  %v1128_v17 = vld [vmem:[%s1642_s1 + $0xa8] ss:$12 sps:$4 sm:$0xff]   ;;  %v1129_v18 = vld [vmem:[%s1642_s1 + $0xc4] ss:$12 sps:$4 sm:$0xff]  }
  0x3e   : > { %442 = vmatprep.subr.bf16.mxu1 %v1111_v5  ;;  %v1134_v10 = vld [vmem:[%s224_s6 + $0x4] ss:$8 sps:$4 sm:$0xff]   ;;  %v235_v20 = vld [vmem:[%s224_s6 + $0x10] sm:$0x11]  ;;  %v1132_v21 = vld [vmem:[%s224_s6] ss:$8 sps:$4 sm:$0xff]  }
  0x3f   : > { %998 = vmatprep.mubr.msk.bf16.mxu1 %vm431_vm0, %v1134_v10  ;;  %v1131_v19 = vld [vmem:[%s1642_s1 + $0xc0] ss:$12 sps:$4 sm:$0xff]   ;;  %v1135_v22 = vld [vmem:[%s1642_s1 + $0x8] ss:$12 sps:$4 sm:$0xff]   ;;  %v970_v23 = vcombine.high %v235_v20, %v235_v20  ;;  %v969_v25 = vcombine.low %v235_v20, %v235_v20  ;;  %v1139_v26 = vld [vmem:[%s1642_s1 + $0x38] ss:$12 sps:$4 sm:$0xff]  }
  0x40   : > { %v1136_v24 = vld [vmem:[%s1642_s1 + $0x20] ss:$12 sps:$4 sm:$0xff]   ;;  %v1140_v27 = vld [vmem:[%s1642_s1 + $0x50] ss:$12 sps:$4 sm:$0xff]   ;;  %v1141_v28 = vld [vmem:[%s1642_s1 + $0x68] ss:$12 sps:$4 sm:$0xff]  }
  0x41   : > { %443 = vmatpush1.bf16.msra.mxu1 %v1113_v6  ;;  %v1142_v29 = vld [vmem:[%s1642_s1 + $0x80] ss:$12 sps:$4 sm:$0xff]   ;;  %v1143_v30 = vld [vmem:[%s1642_s1 + $0x98] ss:$12 sps:$4 sm:$0xff]   ;;  %v1144_v31 = vld [vmem:[%s1642_s1 + $0xb0] ss:$12 sps:$4 sm:$0xff]  }
  0x42   : > { %444 = vmatprep.subr.bf16.mxu1 %v1114_v7  ;;  %v1145_v32 = vld [vmem:[%s1642_s1 + $0xc8] ss:$12 sps:$4 sm:$0xff]   ;;  %v1146_v33 = vld [vmem:[%s1643_s2] sm:$0xff]   ;;  %v1149_v36 = vld [vmem:[%s1643_s2 + $0x18] sm:$0xff]   ;;  %vm559_vm1 = vcmask 1046528   ;;  %vm682_vm2 = vcmask 1043456  }
  0x43   : > { %687 = vmatpush1.bf16.msra.mxu0 %v1146_v33  ;;  %v1147_v34 = vld [vmem:[%s1643_s2 + $0x8] sm:$0xff]   ;;  %v1150_v37 = vld [vmem:[%s1643_s2 + $0x20] sm:$0xff]   ;;  %v1152_v39 = vld [vmem:[%s1643_s2 + $0x30] sm:$0xff]   ;;  %vm542_vm3 = vsmask.f32 7424  ;;  %s1288_s12 = smov 72  }
  0x44   : > { %688 = vmatprep.subr.bf16.mxu0 %v1287_v0  ;;  %v1151_v38 = vld [vmem:[%s1643_s2 + $0x28] sm:$0xff]   ;;  %v1153_v40 = vld [vmem:[%s1643_s2 + $0x38] sm:$0xff]   ;;  %v1154_v41 = vld [vmem:[%s1643_s2 + $0x40] sm:$0xff]   ;;  %s1289_s13 = smov 16   ;;  %vm679_vm4 = vcmask 719872   ;;  %vm565_vm5 = vcmask 588800  }
  0x45   : > { %445 = vmatpush1.bf16.msra.mxu1 %v1116_v8  ;;  %v1155_v42 = vld [vmem:[%s1643_s2 + $0x48] sm:$0xff]   ;;  %v1156_v43 = vld [vmem:[%s1643_s2 + $0x50] sm:$0xff]   ;;  %v1157_v44 = vld [vmem:[%s1643_s2 + $0x58] sm:$0xff]   ;;  %vm799_vm6 = vcmask 523264   ;;  %s217_s14 = sand.u32 1, %s1266_s16   ;;  %s1031_s6 = sshll.u32 %s1274_s18, 9 }
  0x46   : > { %446 = vmatprep.subr.bf16.mxu1 %v1117_v9  ;;  %v1158_v45 = vld [vmem:[%s1643_s2 + $0x60] sm:$0xff]   ;;  %v1159_v7 = vld [vmem:[%s1643_s2 + $0x68] ss:$0 sps:$4 sm:$0xff]   ;;  %s965_s21 = sshll.u32 %s217_s14, 5  ;;  %s1592_s7 = scalar_lea.hbm %s1645_s4, %s1031_s6 }
  0x47   : > { %689 = vmatpush1.bf16.msra.mxu0 %v1147_v34  ;;  %v684_v9 = vsel %vm682_vm2, %v1159_v7, 0  ;;  %v1163_v33 = vld [vmem:[#allocation2 + $0x10] ss:$8 sps:$4 sm:$0xff]   ;;  %v1168_v34 = vld [vmem:[#allocation2 + $0x24] ss:$8 sps:$4 sm:$0xff]   ;;  %s219_s22 = scalar_lea.vmem [#allocation5], %s965_s21 }
  0x48   : > { %690 = vmatprep.subr.bf16.mxu0 %v1287_v0  ;;  %s871_s24 = sshll.u32 %s219_s22, 4  ;;  %s1594_s18 = scalar_lea.sflag [#allocation4], %s217_s14  ;;  %s1587_s24 = int_to_ptr.vmem [resolvable:$true] %s871_s24 }
  0x49   : > { %447 = vmatpush1.bf16.msra.mxu1 %v1119_v11  ;;  %s1200_s8 = scalar_lea.vmem %s1587_s24, 512  ;;  %p1657_p10 = scmp.ne.s32.totalorder %s1650_s25, 0 }
  0x4a   : > { %448 = vmatprep.subr.bf16.mxu1 %v1120_v12  ;;  %p1201_p8 = scmp.ne.s32.totalorder %s1587_s24, %s1200_s8  ;;  %s1290_s9 = smov [#allocation5]  }
  0x4b   : > { %691 = vmatpush1.bf16.msra.mxu0 %v1148_v35  ;;  %v1166_v35 = vld [vmem:[#allocation2 + $0x20] ss:$8 sps:$4 sm:$0xff]   ;;  %s1204_s29 = sshll.u32 %s1290_s9, 4  ;;  %s1205_s29 = int_to_ptr.vmem [resolvable:$false] %s1204_s29 }
  0x4c   : > { %692 = vmatprep.subr.bf16.mxu0 %v1287_v0  ;;  %p1202_p11 = pnand %p1201_p8, %p1657_p10  ;;  %s1206_s10 = scalar_lea.vmem %s1205_s29, 1024 }
  0x4d   : > { %449 = vmatpush1.bf16.msra.mxu1 %v1122_v13  ;;  %p1207_p1 = scmp.lt.s32.totalorder %s1587_s24, %s1205_s29  ;;  %p1208_p3 = scmp.lt.s32.totalorder %s1206_s10, %s1200_s8 }
  0x4e   : > { %450 = vmatprep.subr.bf16.mxu1 %v1123_v14  ;;  %p1203_p13 = pneg %p1202_p11 }
  0x4f   : > { %693 = vmatpush1.bf16.msra.mxu0 %v1149_v36  ;;  %v1171_v36 = vld [vmem:[#allocation2 + $0x34] ss:$8 sps:$4 sm:$0xff]   ;;  %p1209_p5 = por %p1208_p3, %p1207_p1 }
  0x50   : > { %694 = vmatprep.subr.bf16.mxu0 %v1287_v0 }
  0x51   : > { %451 = vmatpush1.bf16.msra.mxu1 %v1125_v15  ;;  %p1210_p6 = pnand %p1209_p5, %p1203_p13 }
  0x52   : > { %452 = vmatprep.subr.bf16.mxu1 %v1126_v16 }
  0x53   : > { %695 = vmatpush1.bf16.msra.mxu0 %v1150_v37  ;;  %v1169_v37 = vld [vmem:[#allocation2 + $0x30] ss:$8 sps:$4 sm:$0xff]  }
  0x54   : > { %696 = vmatprep.subr.bf16.mxu0 %v1287_v0 }
  0x55   : > { %453 = vmatpush1.bf16.msra.mxu1 %v1128_v17 }
  0x56   : > { %454 = vmatprep.subr.bf16.mxu1 %v1129_v18  ;;  %v1162_v18 = vld [vmem:[#allocation2 + $0x4] ss:$8 sps:$4 sm:$0xff]  }
  0x57   : > { %697 = vmatpush1.bf16.msra.mxu0 %v1151_v38 }
  0x58   : > { %698 = vmatprep.subr.bf16.mxu0 %v1287_v0 }
  0x59   : > { %455 = vmatpush1.bf16.msra.mxu1 %v1131_v19 }
  0x5a   : > { %489 = vmatprep.subr.bf16.mxu1 %v1287_v0 }
  0x5b   : > { %699 = vmatpush1.bf16.msra.mxu0 %v1152_v39 }
  0x5c   : > { %471 = vmatmul.mubr.bf16.vlgmr.msra.gmra.mrb[0].mxu1 %v1132_v21  ;;  %700 = vmatprep.subr.bf16.mxu0 %v1287_v0 }
  0x5d   : > { %490 = vmatpush1.bf16.msra.mxu1 %v1135_v22  ;;  %999 = vmatprep.mubr.msk.bf16.mxu1 %vm431_vm0, %v970_v23 }
  0x5e   : > { %491 = vmatprep.subr.bf16.mxu1 %v1287_v0 }
  0x5f   : > { %701 = vmatpush1.bf16.msra.mxu0 %v1153_v40 }
  0x60   : > { %702 = vmatprep.subr.bf16.mxu0 %v1287_v0 }
  0x61   : > { %492 = vmatpush1.bf16.msra.mxu1 %v1136_v24 }
  0x62   : > { %493 = vmatprep.subr.bf16.mxu1 %v1287_v0 }
  0x63   : > { %703 = vmatpush1.bf16.msra.mxu0 %v1154_v41 }
  0x64   : > { %481 = vmatmul.mubr.bf16.gmra.mrb[4].mxu1 %v969_v25  ;;  %704 = vmatprep.subr.bf16.mxu0 %v1287_v0 }
  0x65   : > { %494 = vmatpush1.bf16.msra.mxu1 %v1139_v26  ;;  %1000 = vmatprep.mubr.msk.bf16.mxu1 %vm431_vm0, %v1134_v10 }
  0x66   : > { %495 = vmatprep.subr.bf16.mxu1 %v1287_v0 }
  0x67   : > { %705 = vmatpush1.bf16.msra.mxu0 %v1155_v42 }
  0x68   : > { %706 = vmatprep.subr.bf16.mxu0 %v1287_v0 }
  0x69   : > { %496 = vmatpush1.bf16.msra.mxu1 %v1140_v27 }
  0x6a   : > { %497 = vmatprep.subr.bf16.mxu1 %v1287_v0 }
  0x6b   : > { %707 = vmatpush1.bf16.msra.mxu0 %v1156_v43 }
  0x6c   : > { %708 = vmatprep.subr.bf16.mxu0 %v1287_v0 }
  0x6d   : > { %498 = vmatpush1.bf16.msra.mxu1 %v1141_v28 }
  0x6e   : > { %499 = vmatprep.subr.bf16.mxu1 %v1287_v0 }
  0x6f   : > { %709 = vmatpush1.bf16.msra.mxu0 %v1157_v44 }
  0x70   : > { %710 = vmatprep.subr.bf16.mxu0 %v1287_v0 }
  0x71   : > { %500 = vmatpush1.bf16.msra.mxu1 %v1142_v29  ;;  %v1160_v29 = vld [vmem:[#allocation2] ss:$8 sps:$4 sm:$0xff]  }
  0x72   : > { %501 = vmatprep.subr.bf16.mxu1 %v1287_v0 }
  0x73   : > { %711 = vmatpush1.bf16.msra.mxu0 %v1158_v45 }
  0x74   : > { %712 = vmatprep.subr.bf16.mxu0 %v1287_v0 }
  0x75   : > { %502 = vmatpush1.bf16.msra.mxu1 %v1143_v30 }
  0x76   : > { %503 = vmatprep.subr.bf16.mxu1 %v1287_v0 }
  0x77   : > { %713 = vmatpush1.bf16.msra.mxu0 %v684_v9 }
  0x78   : > { %803 = vmatprep.subr.bf16.mxu0 %v1162_v18 }
  0x79   : > { %504 = vmatpush1.bf16.msra.mxu1 %v1144_v31  ;;  %v1165_v31 = vld [vmem:[#allocation2 + $0x14] ss:$8 sps:$4 sm:$0xff]  }
  0x7a   : > { %505 = vmatprep.subr.bf16.mxu1 %v1287_v0 }
  0x7d   : > { %506 = vmatpush1.bf16.msra.mxu1 %v1145_v32 }
  0x80   : > { %522 = vmatmul.mubr.bf16.vlgmr.msra.gmra.mrb[8].mxu1 %v1132_v21 }
  0x81   : > { %1001 = vmatprep.mubr.msk.bf16.mxu1 %vm431_vm0, %v970_v23 }
  0x88   : > { %530 = vmatmul.mubr.bf16.gmra.mrb[12].mxu1 %v969_v25 }
 0x12f   : > { %v472_v46 = vpop.f32.mrb[0].mxu1 }
 0x130   : > { %v785_v47 = vrot.slane %v472_v46, 1  ;;  %v474_v48 = vpop.f32.mrb[1].mxu1 }
 0x131   : > { %v476_v49 = vpop.f32.mrb[2].mxu1  ;;  %v788_v52 = vrot.slane %v474_v48, 1 }
 0x132   : > { %v786_v50 = vrot.slane %v476_v49, 1  ;;  %v478_v51 = vpop.f32.mrb[3].mxu1 }
 0x133   : > { %v789_v53 = vrot.slane %v478_v51, 1 }
 0x134   : > { %v1563_v54 = vsel %vm559_vm1, %v785_v47, %v786_v50 }
 0x135   : > { %v1566_v55 = vsel %vm559_vm1, %v788_v52, %v789_v53 }
 0x137   : > { %v482_v56 = vpop.f32.mrb[4].mxu1 }
 0x138   : > { %v791_v57 = vrot.slane %v482_v56, 1  ;;  %v484_v58 = vpop.f32.mrb[5].mxu1 }
 0x139   : > { %v793_v59 = vrot.slane %v484_v58, 1  ;;  %v486_v60 = vpop.f32.mrb[6].mxu1 }
 0x13a   : > { %v487_v61 = vpop.f32.mrb[7].mxu1  ;;  %v1569_v62 = vsel %vm559_vm1, %v786_v50, %v791_v57 }
 0x13b   : > { %v1572_v63 = vsel %vm559_vm1, %v789_v53, %v793_v59 }
 0x153   : > { %v523_v1 = vpop.f32.mrb[8].mxu1 }
 0x154   : > { %v525_v2 = vpop.f32.mrb[9].mxu1  ;;  %v537_v4 = vmax.f32 %v523_v1, 0.0 }
 0x155   : > { %v526_v3 = vpop.f32.mrb[10].mxu1 }
 0x156   : > { %v538_v5 = vmax.f32 %v526_v3, 0.0  ;;  %v528_v6 = vpop.f32.mrb[11].mxu1 }
 0x158   : > { %v540_v8 = vpack.c.bf16 %v538_v5, %v537_v4 }
 0x15a   : > { %v546_v10 = vshll.u32 %v540_v8, 16  ;;  %v544_v20 = vshrl.u32 %v540_v8, 16  ;;  %v560_v25 = vrot.slane %v540_v8, 1 }
 0x15b   : > { %v531_v11 = vpop.f32.mrb[12].mxu1 }
 0x15c   : > { %v539_v12 = vmax.f32 %v531_v11, 0.0  ;;  %v533_v13 = vpop.f32.mrb[13].mxu1  ;;  %v548_v17 = vrot.slane %v546_v10, 1 }
 0x15d   : > { %v534_v14 = vpop.f32.mrb[14].mxu1 }
 0x15e   : > { %v541_v15 = vpack.c.bf16 %v539_v12, %v539_v12  ;;  %v535_v16 = vpop.f32.mrb[15].mxu1  ;;  %v549_v22 = vor.u32 %v548_v17, %v544_v20 }
 0x160   : > { %v551_v19 = vshll.u32 %v541_v15, 16  ;;  %v561_v23 = vrot.slane %v541_v15, 1 }
 0x162   : > { %v553_v21 = vrot.slane %v551_v19, 1  ;;  %v562_v26 = vsel %vm559_vm1, %v560_v25, %v561_v23 }
 0x164   : > { %v554_v24 = vsel %vm542_vm3, %v549_v22, %v553_v21 }
 0x165   : > { %555 = vrot.lane.b32.xlu0 %v554_v24, %s1288_s12 }
 0x169   : > { %563 = vrot.lane.b32.xlu0 %v562_v26, %s1289_s13 }
 0x1d7   : > { %v556_v27 = vpop.permute.xlu0 %555 }
 0x1d8   : > { %v567_v32 = vsel %vm565_vm5, %v540_v8, %v556_v27 }
 0x1db   : > { %v564_v28 = vpop.permute.xlu0 %563 }
 0x1dc   : > { %v570_v30 = vsel %vm431_vm0, %v556_v27, %v564_v28 }
 0x1dd   : > { %1016 = vmatprep.mubr.msk.bf16.mxu0 %vm679_vm4, %v570_v30 }
 0x1de   : > { %719 = vmatmul.mubr.bf16.vlgmr.msra.gmra.mrb[0].mxu0 %v567_v32 }
 0x1df   : > { %804 = vmatpush1.bf16.msra.mxu0 %v1160_v29  ;;  %835 = vmatprep.mubr.bf16.mxu0 %v1287_v0 }
 0x1e0   : > { %805 = vmatprep.subr.bf16.mxu0 %v1165_v31 }
 0x1e3   : > { %806 = vmatpush1.bf16.msra.mxu0 %v1163_v33 }
 0x1e4   : > { %807 = vmatprep.subr.bf16.mxu0 %v1168_v34 }
 0x1e7   : > { %808 = vmatpush1.bf16.msra.mxu0 %v1166_v35 }
 0x1e8   : > { %809 = vmatprep.subr.bf16.mxu0 %v1171_v36 }
 0x1eb   : > { %810 = vmatpush1.bf16.msra.mxu0 %v1169_v37 }
 0x2b1   : > { %v720_v38 = vpop.f32.mrb[0].mxu0 }
 0x2b2   : > { %v722_v39 = vpop.f32.mrb[1].mxu0  ;;  %v727_v41 = vmax.f32 %v720_v38, 0.0 }
 0x2b3   : > { %v723_v40 = vpop.f32.mrb[2].mxu0 }
 0x2b4   : > { %v728_v42 = vmax.f32 %v723_v40, 0.0  ;;  %v725_v43 = vpop.f32.mrb[3].mxu0 }
 0x2b6   : > { %v729_v0 = vpack.c.bf16 %v728_v42, %v727_v41 }
 0x2b8   : > { %1025 = vmatmul.mubr.msk.bf16.vlgmr.msra.gmra.mrb[4].mxu0 %vm799_vm6, %v729_v0 }
 0x38b   : > { %v837_v44 = vpop.f32.mrb[4].mxu0 }
 0x38c   : > { %v838_v45 = vadd.f32 %v837_v44, %v1563_v54  ;;  %v839_v46 = vpop.f32.mrb[5].mxu0 }
 0x38d   : > { %v840_v47 = vadd.f32 %v839_v46, %v1566_v55  ;;  %v841_v48 = vpop.f32.mrb[6].mxu0 }
 0x38e   : > { %v846_v49 = vmax.f32 %v838_v45, 0.0  ;;  %v842_v50 = vadd.f32 %v841_v48, %v1569_v62  ;;  %v843_v51 = vpop.f32.mrb[7].mxu0 }
 0x38f   : > { %v847_v52 = vmax.f32 %v840_v47, 0.0  ;;  %v844_v53 = vadd.f32 %v843_v51, %v1572_v63 }
 0x390   : > { %850 = vst [vmem:[%s219_s22] sm:$0xff] %v846_v49  ;;  %v848_v54 = vmax.f32 %v842_v50, 0.0 }
 0x391   : > { %851 = vst [vmem:[%s219_s22 + $0x8] sm:$0xff] %v847_v52  ;;  %v849_v56 = vmax.f32 %v844_v53, 0.0 }
 0x392   : > { %852 = vst [vmem:[%s219_s22 + $0x10] sm:$0xff] %v848_v54 }
 0x393   : > { %853 = vst [vmem:[%s219_s22 + $0x18] sm:$0xff] %v849_v56 }
 0x394   : > { %1213 = shalt.err (!%p1210_p6)
}
 0x395   : > { %s1214_s30 = scalar_lea.hbm %s1592_s7, 512  ;;  %s1218_s14 = scalar_lea.hbm %s1645_s4, 1024 }
 0x396   : > { %p1215_p7 = scmp.ne.s32.totalorder %s1592_s7, %s1214_s30  ;;  %p1219_p0 = scmp.lt.u32.totalorder %s1592_s7, %s1645_s4 }
 0x397   : > { %p1220_p2 = scmp.lt.u32.totalorder %s1218_s14, %s1214_s30  ;;  %p1222_p8 = scmp.lt.u32.totalorder %s1214_s30, %s1592_s7 }
 0x398   : > { %p1216_p9 = pnand %p1215_p7, %p1657_p10 }
 0x399   : > { %p1221_p4 = por %p1220_p2, %p1219_p0 }
 0x39a   : > { %p1217_p12 = pneg %p1216_p9 }
 0x39b   : > { %p1223_p11 = por %p1222_p8, %p1221_p4 }
 0x39d   : > { %p1224_p13 = pnand %p1223_p11, %p1217_p12 }
 0x39f   : > { %1227 = shalt.err (!%p1224_p13)
}
 0x3a0   : > { %s1291_s6 = smov 256  }
 0x3a1   : > { %1037 = dma.vmem_to_hbm [thread:$0]  (%p1657_p10), %s1587_s24, 512, %s1592_s7, %s1594_s18, %s1291_s6, %s1291_s6, %s1289_s13  }
 0x3a2 PF: > { %p1049_p1 = scmp.ge.s32.totalorder %s1282_s20, 2  ;;  %s886_s26 = sand.u32 1, %s1262_s15  }
 0x3a3   : > { %p1658_p3 = scmp.ne.s32.totalorder %s1651_s27, 0  ;;  %s887_s5 = scalar_lea.sflag [#allocation4], %s886_s26 }
 0x3a5   : > { %p1044_p5 = pnand %p1049_p1, %p1658_p3 }
 0x3a7   : > { %1257 = dma.done.wait (!%p1044_p5), %s887_s5, 512  }
 0x3a8   : > { %1259 = vsyncadd (!%p1044_p5), %s887_s5, 4294966784  ;;  %s18_s20 = sadd.s32 1, %s1282_s20   ;;  %s1659_s15 = smov %s1266_s16 }
 0x3a9   : > { %p15_p6 = scmp.ge.s32.totalorder %s18_s20, 4   ;;  %s1660_s16 = smov %s1270_s17 }
 0x3aa   : > { %s1661_s17 = smov %s1370_s28  ;;  %s1662_s18 = smov %s1278_s19 }
 0x3ab   : > { %s1663_s19 = smov %s1665_s23  ;;  %17 = sbr.rel (!%p15_p6) target bundleno = 5 (0x5), region = 77 }
 0x3b2   :  { %892 = vsyncpa [#allocation3], 1 }
 0x3b3   :  { %894 = vsyncpa [#allocation3 + $0x1], 1 }
 0x3b4   :  { %895 = vsyncpa [#allocation4], 1 }
 0x3b5   :  { %897 = vsyncpa [#allocation4 + $0x1], 1 }

</bundles_post_ra>
